<compile_context>
chip_gen: v6e
topology: v6e:2x2x1
jax: 0.10.0
libtpu: 0.0.40
codegen_flags: <defaults>
</compile_context>

<pallas_src>
import functools
import math

import jax
import jax.numpy as jnp
from jax.experimental import pallas as pl
from jax.experimental.pallas import tpu as pltpu


_LANE = 128
_FUSED_IMG_LIMIT = 8 * 1024 * 1024   # max (C, HW) image slab for the fused path
_BLOCK_TARGET = 8 * 1024 * 1024      # target bytes of x moved per grid step
_CHUNK_TARGET = 512 * 1024           # target bytes per in-kernel channel chunk
_BT_MAX = 32                         # cap on images folded (and unrolled) per step


def _cdiv(a, b):
    return -(-a // b)


def _round_up(a, m):
    return _cdiv(a, m) * m


def _vmem_limit(block_bytes):
    # in + out, double buffered, plus scratch headroom; >=32 MiB (v5e default is 16).
    return int(min(48 << 20, max(32 << 20, 4 * block_bytes + (4 << 20))))


def _channel_conv_sigmoid(avg, w_ref, k, pad):
    """sigmoid(Conv1d 'same' along channels) for avg: (C, N) f32, C on sublanes.

    Zero padding is realised exactly with a cyclic sublane roll + mask: tap j
    (offset off = j - pad) only contributes where 0 <= ci + off < C, and there
    the cyclic index equals ci + off.
    """
    c = avg.shape[0]
    idx = jax.lax.broadcasted_iota(jnp.int32, avg.shape, 0)
    acc = jnp.zeros_like(avg)
    for j in range(k):
        off = j - pad
        shifted = pltpu.roll(avg, shift=(-off) % c, axis=0)     # XLU sublane roll
        valid = (idx + off >= 0) & (idx + off < c)
        acc = acc + w_ref[j] * jnp.where(valid, shifted, 0.0)
    return jax.nn.sigmoid(acc)


# --------------------------- fused single-pass path ---------------------------

def _eca_fused_kernel(w_ref, x_ref, o_ref, g_ref, *, k, pad, c_chunk, inv_hw):
    # w_ref: (k,) SMEM conv weights
    # x_ref/o_ref: (BT, C, HW) VMEM block (BT images folded per grid step)
    # g_ref: (C, BT) float32 VMEM scratch (pooled sums, then attention gate)
    bt, c, _ = x_ref.shape
    chunks = [(c0, min(c_chunk, c - c0)) for c0 in range(0, c, c_chunk)]

    # ---- pass 1: global average pool over H*W (lane reduce), chunked over C ----
    # Static Python loops -> fully unrolled for LLO scheduling visibility.
    for bi in range(bt):
        for c0, cc in chunks:
            xs = x_ref[bi, c0:c0 + cc, :].astype(jnp.float32)          # (cc, HW)
            g_ref[c0:c0 + cc, bi:bi + 1] = jnp.sum(xs, axis=-1, keepdims=True)

    # ---- 1D 'same' conv along channels + sigmoid, once for all BT images ----
    g_ref[...] = _channel_conv_sigmoid(g_ref[...] * inv_hw, w_ref, k, pad)

    # ---- pass 2: gated broadcast multiply in the input dtype (bf16 stays bf16) ----
    for bi in range(bt):
        gate = g_ref[:, bi:bi + 1].astype(o_ref.dtype)                 # (C, 1)
        for c0, cc in chunks:
            o_ref[bi, c0:c0 + cc, :] = (
                x_ref[bi, c0:c0 + cc, :] * gate[c0:c0 + cc, :])


def _pick_bt(b, per_img_bytes):
    bt = max(1, min(b, _BLOCK_TARGET // max(1, per_img_bytes), _BT_MAX))
    # Prefer >=2 grid steps (both v7x TensorCores) when each still moves >= 1 MiB.
    if bt >= b and b > 1 and _cdiv(b, 2) * per_img_bytes >= (1 << 20):
        bt = _cdiv(b, 2)
    grid0 = _cdiv(b, bt)
    return _cdiv(b, grid0), grid0            # rebalance bt so steps are even


def _pick_c_chunk(c, hw_pad, itemsize):
    if c < 8:
        return c
    rows = (_CHUNK_TARGET // max(1, hw_pad * itemsize)) // 8 * 8
    return max(8, min(c, rows))


def _eca_fused(x3, w, k, pad, hw):
    b, c, _ = x3.shape
    itemsize = x3.dtype.itemsize
    hw_pad = _round_up(hw, _LANE)
    per_img = c * hw_pad * itemsize
    bt, grid0 = _pick_bt(b, per_img)
    c_chunk = _pick_c_chunk(c, hw_pad, itemsize)
    kernel = functools.partial(_eca_fused_kernel, k=k, pad=pad,
                               c_chunk=c_chunk, inv_hw=1.0 / hw)
    return pl.pallas_call(
        kernel,
        out_shape=jax.ShapeDtypeStruct((b, c, hw), x3.dtype),
        grid=(grid0,),
        in_specs=[
            pl.BlockSpec(memory_space=pltpu.MemorySpace.SMEM),     # conv weights
            pl.BlockSpec((bt, c, hw), lambda i: (i, 0, 0)),        # bt images/step
        ],
        out_specs=pl.BlockSpec((bt, c, hw), lambda i: (i, 0, 0)),
        scratch_shapes=[pltpu.VMEM((c, bt), jnp.float32)],
        compiler_params=pltpu.CompilerParams(
            dimension_semantics=("parallel",),
            vmem_limit_bytes=_vmem_limit(bt * per_img),
        ),
        cost_estimate=pl.CostEstimate(
            flops=2 * b * c * hw,
            transcendentals=b * c,
            bytes_accessed=2 * b * c * hw * itemsize,
        ),
    )(w, x3)


# ------------------- HW-split path for large images (v7x VMEM) -------------------

def _pool_sum_kernel(x_ref, sum_ref, *, hw):
    # Accumulate per-channel sums over HW chunks; grid = (B, n_hw_chunks).
    j = pl.program_id(1)
    hw_chunk = x_ref.shape[2]

    @pl.when(j == 0)
    def _():
        sum_ref[...] = jnp.zeros_like(sum_ref)

    lane = jax.lax.broadcasted_iota(jnp.int32, x_ref.shape, 2) + j * hw_chunk
    xs = jnp.where(lane < hw, x_ref[...].astype(jnp.float32), 0.0)   # mask ragged tail
    sum_ref[...] += jnp.sum(xs, axis=-1, keepdims=True)


def _gated_mul_kernel(w_ref, sum_ref, x_ref, o_ref, g_ref, *, k, pad, inv_hw):
    # Compute the gate once per image (first HW chunk), reuse it for later chunks.
    @pl.when(pl.program_id(1) == 0)
    def _():
        g_ref[...] = _channel_conv_sigmoid(sum_ref[0] * inv_hw, w_ref, k, pad)

    gate = g_ref[...].astype(o_ref.dtype)                            # (C, 1)
    o_ref[0] = x_ref[0] * gate


def _eca_split(x3, w, k, pad, hw):
    b, c, _ = x3.shape
    itemsize = x3.dtype.itemsize
    # HW chunk: lane-aligned (multiple of 128), ~4 MiB per (C, hw_chunk) slab.
    rows = max(1, (4 << 20) // max(1, c * itemsize))
    hw_chunk = max(_LANE, min(rows // _LANE * _LANE, hw // _LANE * _LANE))
    n_hw = _cdiv(hw, hw_chunk)
    block_bytes = c * hw_chunk * itemsize

    sums = pl.pallas_call(
        functools.partial(_pool_sum_kernel, hw=hw),
        out_shape=jax.ShapeDtypeStruct((b, c, 1), jnp.float32),
        grid=(b, n_hw),
        in_specs=[pl.BlockSpec((1, c, hw_chunk), lambda i, j: (i, 0, j))],
        out_specs=pl.BlockSpec((1, c, 1), lambda i, j: (i, 0, 0)),
        compiler_params=pltpu.CompilerParams(
            dimension_semantics=("parallel", "arbitrary"),
            vmem_limit_bytes=_vmem_limit(block_bytes),
        ),
    )(x3)

    return pl.pallas_call(
        functools.partial(_gated_mul_kernel, k=k, pad=pad, inv_hw=1.0 / hw),
        out_shape=jax.ShapeDtypeStruct((b, c, hw), x3.dtype),
        grid=(b, n_hw),
        in_specs=[
            pl.BlockSpec(memory_space=pltpu.MemorySpace.SMEM),     # conv weights
            pl.BlockSpec((1, c, 1), lambda i, j: (i, 0, 0)),       # pooled sums
            pl.BlockSpec((1, c, hw_chunk), lambda i, j: (i, 0, j)),
        ],
        out_specs=pl.BlockSpec((1, c, hw_chunk), lambda i, j: (i, 0, j)),
        scratch_shapes=[pltpu.VMEM((c, 1), jnp.float32)],
        compiler_params=pltpu.CompilerParams(
            dimension_semantics=("parallel", "arbitrary"),
            vmem_limit_bytes=_vmem_limit(block_bytes),
        ),
    )(w, sums, x3)


# ---------------------------------- wrapper ----------------------------------

@jax.jit
def eca_block(x, conv_w):
    """ECA forward. x: (B, C, H, W); conv_w: Conv1d(1,1,k) weight flattened to (k,)."""
    b, c, h, w = x.shape
    hw = h * w
    wk = jnp.asarray(conv_w, jnp.float32).reshape(-1)
    k = int(wk.shape[0])
    pad = k // 2
    itemsize = x.dtype.itemsize
    per_img = c * _round_up(hw, _LANE) * itemsize

    x3 = x.reshape(b, c, hw)   # lane-dense (C, H*W) tiles; free for contiguous NCHW
    # TODO(synk): for HW < 128 the lane dim pads to 128 (masked stores, inflated
    # VMEM); avoiding that would need channels-last input, which NCHW cannot give.
    if per_img <= _FUSED_IMG_LIMIT or hw < 2 * _LANE:
        out3 = _eca_fused(x3, wk, k, pad, hw)
    else:
        out3 = _eca_split(x3, wk, k, pad, hw)
    return out3.reshape(b, c, h, w)


def _eca_reference(x, conv_w):
    """Pure-JAX reference mirroring the PyTorch forward."""
    b, c, h, w = x.shape
    k = conv_w.shape[0]
    pad = k // 2
    avg = jnp.mean(x, axis=(2, 3))                   # (B, C)
    padded = jnp.pad(avg, ((0, 0), (pad, pad)))      # zero 'same' padding
    out = jnp.zeros_like(avg)
    for j in range(k):
        out = out + conv_w[j] * padded[:, j:j + c]
    attn = jax.nn.sigmoid(out)
    return x * attn[:, :, None, None]


if __name__ == "__main__":
    # Module hyperparameters (matches Eca_block.__init__ for in_channel=16):
    in_channel, gamma, b_param = 16, 2, 1
    kernel_size = int(abs((math.log(in_channel, 2) + b_param) / gamma))
    kernel_size = kernel_size if kernel_size % 2 else kernel_size + 1   # -> 3

    key = jax.random.PRNGKey(0)
    kx, kw = jax.random.split(key)

    batch, height, width = 2, 16, 16
    x = jax.random.normal(kx, (batch, in_channel, height, width), jnp.float32)
    # Deterministic synthetic Conv1d weight (out=1, in=1, k) -> flattened (k,)
    conv_w = jax.random.normal(kw, (kernel_size,), jnp.float32) * 0.5

    ref = _eca_reference(x, conv_w)

    out = jax.block_until_ready(eca_block(x, conv_w))

    assert out.shape == x.shape and out.dtype == x.dtype
    assert jnp.allclose(out, ref, atol=1e-5, rtol=1e-5), "mismatch vs reference"

    print("KERNEL_OK")
</pallas_src>

<mosaic_0001>
module attributes {stable_mosaic.version = 11 : i64} {
  func.func @_eca_fused_kernel(%arg0: i32, %arg1: memref<3xf32, #tpu.memory_space<smem>>, %arg2: memref<2x16x256xf32, #tpu.memory_space<vmem>>, %arg3: memref<2x16x256xf32, #tpu.memory_space<vmem>>, %arg4: memref<16x2xf32, #tpu.memory_space<vmem>>) attributes {dimension_semantics = [#tpu.dimension_semantics<parallel>], iteration_bounds = array<i64: 1>, scalar_prefetch = 0 : i64, scratch_operands = 1 : i64, tpu.core_type = #tpu.core_type<tc>, window_params = [{transform_indices = @transform_0, window_bounds = array<i64: 3>}, {transform_indices = @transform_1, window_bounds = array<i64: 2, 16, 256>}, {transform_indices = @transform_2, window_bounds = array<i64: 2, 16, 256>}]} {
    %c0 = arith.constant 0 : index
    %c0_0 = arith.constant 0 : index
    %c0_1 = arith.constant 0 : index
    %0 = vector.load %arg2[%c0, %c0_0, %c0_1] : memref<2x16x256xf32, #tpu.memory_space<vmem>>, vector<1x16x256xf32>
    %1 = vector.shape_cast %0 : vector<1x16x256xf32> to vector<16x256xf32>
    %cst = arith.constant dense<0.000000e+00> : vector<16xf32>
    %2 = vector.multi_reduction <add>, %1, %cst [1] : vector<16x256xf32> to vector<16xf32>
    %3 = vector.shape_cast %2 : vector<16xf32> to vector<16x1xf32>
    %c0_2 = arith.constant 0 : index
    %c0_3 = arith.constant 0 : index
    %4 = vector.load %arg4[%c0_2, %c0_3] : memref<16x2xf32, #tpu.memory_space<vmem>>, vector<16x1xf32>
    tpu.vector_store %arg4[%c0_2, %c0_3], %3 {strides = array<i32>} : memref<16x2xf32, #tpu.memory_space<vmem>>, vector<16x1xf32>,
    %c1 = arith.constant 1 : index
    %c0_4 = arith.constant 0 : index
    %c0_5 = arith.constant 0 : index
    %5 = vector.load %arg2[%c1, %c0_4, %c0_5] : memref<2x16x256xf32, #tpu.memory_space<vmem>>, vector<1x16x256xf32>
    %6 = vector.shape_cast %5 : vector<1x16x256xf32> to vector<16x256xf32>
    %cst_6 = arith.constant dense<0.000000e+00> : vector<16xf32>
    %7 = vector.multi_reduction <add>, %6, %cst_6 [1] : vector<16x256xf32> to vector<16xf32>
    %8 = vector.shape_cast %7 : vector<16xf32> to vector<16x1xf32>
    %c0_7 = arith.constant 0 : index
    %c1_8 = arith.constant 1 : index
    %9 = vector.load %arg4[%c0_7, %c1_8] : memref<16x2xf32, #tpu.memory_space<vmem>>, vector<16x1xf32>
    tpu.vector_store %arg4[%c0_7, %c1_8], %8 {strides = array<i32>} : memref<16x2xf32, #tpu.memory_space<vmem>>, vector<16x1xf32>,
    %c0_9 = arith.constant 0 : index
    %c0_10 = arith.constant 0 : index
    %10 = vector.load %arg4[%c0_9, %c0_10] : memref<16x2xf32, #tpu.memory_space<vmem>>, vector<16x2xf32>
    %cst_11 = arith.constant 3.906250e-03 : f32
    %11 = vector.broadcast %cst_11 : f32 to vector<16x2xf32>
    %12 = arith.mulf %10, %11 : vector<16x2xf32>
    %13 = tpu.iota {dimensions = array<i32: 0>} : vector<16x2xi32>
    %cst_12 = arith.constant 0.000000e+00 : f32
    %14 = vector.broadcast %cst_12 : f32 to vector<16x2xf32>
    %c1_i32 = arith.constant 1 : i32
    %15 = tpu.dynamic_rotate %12 by %c1_i32 dim 0 : vector<16x2xf32>, i32 -> vector<16x2xf32>
    %c-1_i32 = arith.constant -1 : i32
    %16 = vector.broadcast %c-1_i32 : i32 to vector<16x2xi32>
    %17 = arith.addi %13, %16 : vector<16x2xi32>
    %c0_i32 = arith.constant 0 : i32
    %18 = vector.broadcast %c0_i32 : i32 to vector<16x2xi32>
    %19 = arith.cmpi sge, %17, %18 : vector<16x2xi32>
    %c-1_i32_13 = arith.constant -1 : i32
    %20 = vector.broadcast %c-1_i32_13 : i32 to vector<16x2xi32>
    %21 = arith.addi %13, %20 : vector<16x2xi32>
    %c16_i32 = arith.constant 16 : i32
    %22 = vector.broadcast %c16_i32 : i32 to vector<16x2xi32>
    %23 = arith.cmpi slt, %21, %22 : vector<16x2xi32>
    %24 = arith.andi %19, %23 : vector<16x2xi1>
    %c0_14 = arith.constant 0 : index
    %25 = memref.load %arg1[%c0_14] : memref<3xf32, #tpu.memory_space<smem>>
    %cst_15 = arith.constant 0.000000e+00 : f32
    %26 = vector.broadcast %cst_15 : f32 to vector<16x2xf32>
    %27 = arith.select %24, %15, %26 : vector<16x2xi1>, vector<16x2xf32>
    %28 = vector.broadcast %25 : f32 to vector<16x2xf32>
    %29 = arith.mulf %28, %27 : vector<16x2xf32>
    %30 = arith.addf %14, %29 : vector<16x2xf32>
    %c0_i32_16 = arith.constant 0 : i32
    %31 = tpu.dynamic_rotate %12 by %c0_i32_16 dim 0 : vector<16x2xf32>, i32 -> vector<16x2xf32>
    %c0_i32_17 = arith.constant 0 : i32
    %32 = vector.broadcast %c0_i32_17 : i32 to vector<16x2xi32>
    %33 = arith.addi %13, %32 : vector<16x2xi32>
    %c0_i32_18 = arith.constant 0 : i32
    %34 = vector.broadcast %c0_i32_18 : i32 to vector<16x2xi32>
    %35 = arith.cmpi sge, %33, %34 : vector<16x2xi32>
    %c0_i32_19 = arith.constant 0 : i32
    %36 = vector.broadcast %c0_i32_19 : i32 to vector<16x2xi32>
    %37 = arith.addi %13, %36 : vector<16x2xi32>
    %c16_i32_20 = arith.constant 16 : i32
    %38 = vector.broadcast %c16_i32_20 : i32 to vector<16x2xi32>
    %39 = arith.cmpi slt, %37, %38 : vector<16x2xi32>
    %40 = arith.andi %35, %39 : vector<16x2xi1>
    %c1_21 = arith.constant 1 : index
    %41 = memref.load %arg1[%c1_21] : memref<3xf32, #tpu.memory_space<smem>>
    %cst_22 = arith.constant 0.000000e+00 : f32
    %42 = vector.broadcast %cst_22 : f32 to vector<16x2xf32>
    %43 = arith.select %40, %31, %42 : vector<16x2xi1>, vector<16x2xf32>
    %44 = vector.broadcast %41 : f32 to vector<16x2xf32>
    %45 = arith.mulf %44, %43 : vector<16x2xf32>
    %46 = arith.addf %30, %45 : vector<16x2xf32>
    %c15_i32 = arith.constant 15 : i32
    %47 = tpu.dynamic_rotate %12 by %c15_i32 dim 0 : vector<16x2xf32>, i32 -> vector<16x2xf32>
    %c1_i32_23 = arith.constant 1 : i32
    %48 = vector.broadcast %c1_i32_23 : i32 to vector<16x2xi32>
    %49 = arith.addi %13, %48 : vector<16x2xi32>
    %c0_i32_24 = arith.constant 0 : i32
    %50 = vector.broadcast %c0_i32_24 : i32 to vector<16x2xi32>
    %51 = arith.cmpi sge, %49, %50 : vector<16x2xi32>
    %c1_i32_25 = arith.constant 1 : i32
    %52 = vector.broadcast %c1_i32_25 : i32 to vector<16x2xi32>
    %53 = arith.addi %13, %52 : vector<16x2xi32>
    %c16_i32_26 = arith.constant 16 : i32
    %54 = vector.broadcast %c16_i32_26 : i32 to vector<16x2xi32>
    %55 = arith.cmpi slt, %53, %54 : vector<16x2xi32>
    %56 = arith.andi %51, %55 : vector<16x2xi1>
    %c2 = arith.constant 2 : index
    %57 = memref.load %arg1[%c2] : memref<3xf32, #tpu.memory_space<smem>>
    %cst_27 = arith.constant 0.000000e+00 : f32
    %58 = vector.broadcast %cst_27 : f32 to vector<16x2xf32>
    %59 = arith.select %56, %47, %58 : vector<16x2xi1>, vector<16x2xf32>
    %60 = vector.broadcast %57 : f32 to vector<16x2xf32>
    %61 = arith.mulf %60, %59 : vector<16x2xf32>
    %62 = arith.addf %46, %61 : vector<16x2xf32>
    %63 = arith.negf %62 : vector<16x2xf32>
    %64 = math.exp %63 : vector<16x2xf32>
    %cst_28 = arith.constant 1.000000e+00 : f32
    %65 = vector.broadcast %cst_28 : f32 to vector<16x2xf32>
    %66 = arith.addf %65, %64 : vector<16x2xf32>
    %67 = arith.divf %65, %66 : vector<16x2xf32>
    %c0_29 = arith.constant 0 : index
    %c0_30 = arith.constant 0 : index
    %68 = vector.load %arg4[%c0_29, %c0_30] : memref<16x2xf32, #tpu.memory_space<vmem>>, vector<16x2xf32>
    tpu.vector_store %arg4[%c0_29, %c0_30], %67 {strides = array<i32>} : memref<16x2xf32, #tpu.memory_space<vmem>>, vector<16x2xf32>,
    %c0_31 = arith.constant 0 : index
    %c0_32 = arith.constant 0 : index
    %69 = vector.load %arg4[%c0_31, %c0_32] : memref<16x2xf32, #tpu.memory_space<vmem>>, vector<16x1xf32>
    %c0_33 = arith.constant 0 : index
    %c0_34 = arith.constant 0 : index
    %c0_35 = arith.constant 0 : index
    %70 = vector.load %arg2[%c0_33, %c0_34, %c0_35] : memref<2x16x256xf32, #tpu.memory_space<vmem>>, vector<1x16x256xf32>
    %71 = vector.shape_cast %70 : vector<1x16x256xf32> to vector<16x256xf32>
    %72 = vector.broadcast %69 : vector<16x1xf32> to vector<16x256xf32>
    %73 = arith.mulf %71, %72 : vector<16x256xf32>
    %c0_36 = arith.constant 0 : index
    %c0_37 = arith.constant 0 : index
    %c0_38 = arith.constant 0 : index
    %74 = vector.load %arg3[%c0_36, %c0_37, %c0_38] : memref<2x16x256xf32, #tpu.memory_space<vmem>>, vector<1x16x256xf32>
    %75 = vector.shape_cast %74 : vector<1x16x256xf32> to vector<16x256xf32>
    %76 = vector.shape_cast %73 : vector<16x256xf32> to vector<1x16x256xf32>
    tpu.vector_store %arg3[%c0_36, %c0_37, %c0_38], %76 {strides = array<i32>} : memref<2x16x256xf32, #tpu.memory_space<vmem>>, vector<1x16x256xf32>,
    %c0_39 = arith.constant 0 : index
    %c1_40 = arith.constant 1 : index
    %77 = vector.load %arg4[%c0_39, %c1_40] : memref<16x2xf32, #tpu.memory_space<vmem>>, vector<16x1xf32>
    %c1_41 = arith.constant 1 : index
    %c0_42 = arith.constant 0 : index
    %c0_43 = arith.constant 0 : index
    %78 = vector.load %arg2[%c1_41, %c0_42, %c0_43] : memref<2x16x256xf32, #tpu.memory_space<vmem>>, vector<1x16x256xf32>
    %79 = vector.shape_cast %78 : vector<1x16x256xf32> to vector<16x256xf32>
    %80 = vector.broadcast %77 : vector<16x1xf32> to vector<16x256xf32>
    %81 = arith.mulf %79, %80 : vector<16x256xf32>
    %c1_44 = arith.constant 1 : index
    %c0_45 = arith.constant 0 : index
    %c0_46 = arith.constant 0 : index
    %82 = vector.load %arg3[%c1_44, %c0_45, %c0_46] : memref<2x16x256xf32, #tpu.memory_space<vmem>>, vector<1x16x256xf32>
    %83 = vector.shape_cast %82 : vector<1x16x256xf32> to vector<16x256xf32>
    %84 = vector.shape_cast %81 : vector<16x256xf32> to vector<1x16x256xf32>
    tpu.vector_store %arg3[%c1_44, %c0_45, %c0_46], %84 {strides = array<i32>} : memref<2x16x256xf32, #tpu.memory_space<vmem>>, vector<1x16x256xf32>,
    return
  }
  func.func @transform_0(%arg0: i32) -> i32 {
    %c0_i32 = arith.constant 0 : i32
    %c0_i32_0 = arith.constant 0 : i32
    return %c0_i32 : i32
  }
  func.func @transform_1(%arg0: i32) -> (i32, i32, i32) {
    %c0_i32 = arith.constant 0 : i32
    %c0_i32_0 = arith.constant 0 : i32
    %c0_i32_1 = arith.constant 0 : i32
    return %arg0, %c0_i32, %c0_i32_0 : i32, i32, i32
  }
  func.func @transform_2(%arg0: i32) -> (i32, i32, i32) {
    %c0_i32 = arith.constant 0 : i32
    %c0_i32_0 = arith.constant 0 : i32
    %c0_i32_1 = arith.constant 0 : i32
    return %arg0, %c0_i32, %c0_i32_0 : i32, i32, i32
  }
}

</mosaic_0001>

<bundles_post_ra>
// kernel: eca_block.1
= control target key start
LH: loop header
LB: loop body
LE: loop exit
PB: predicated region body
PF: predicated region fallthrough
CT: control target
= control target key end

     0   :  { %7 = vsyncpa [#allocation4], 0  ;;  %s332_s0 = inlined_call_operand.vmem [shape: f32[3], index: 0, kind: input, shape index: {}]   ;;  %s333_s1 = inlined_call_operand.vmem [shape: f32[2,16,256], index: 1, kind: input, shape index: {}]   ;;  %s334_s2 = inlined_call_operand.vmem [shape: f32[2,16,256], index: 2, kind: output, shape index: {}]  }
   0x1   :  { %s14_s11 = sshll.u32 %s332_s0, 4  ;;  %s15_s11 = int_to_ptr.vmem [resolvable:$true] %s14_s11 }
   0x2   :  { %s214_s12 = scalar_lea.vmem %s15_s11, 16  ;;  %p219_p1 = scmp.lt.s32.totalorder %s15_s11, %s15_s11 }
   0x3   :  { %p215_p0 = scmp.ne.s32.totalorder %s15_s11, %s214_s12  ;;  %p220_p2 = scmp.lt.s32.totalorder %s214_s12, %s214_s12 }
   0x5   :  { %p221_p3 = por %p220_p2, %p219_p1 }
   0x7   :  { %p222_p4 = pnand %p221_p3, %p215_p0 }
   0x9   :  { %225 = shalt.err (!%p222_p4)
}
   0xa   :  { %s228_s13 = smov [#allocation3]  }
   0xb   :  { %17 = dma.vmem_to_smem %s15_s11, 16, %s228_s13, [#allocation4]  }
   0xc   :  { %226 = dma.done.wait [#allocation4], 16  }
   0xd   :  { %227 = vsyncadd [#allocation4], 4294967280 }
   0xe   :  { %23 = sfence }
   0xf   :  { %v252_v0 = vld [vmem:[%s333_s1] sm:$0xff]  ;;  %v257_v1 = vld [vmem:[%s333_s1 + $0x8] sm:$0xff]  ;;  %v274_v5 = vld [vmem:[%s333_s1 + $0x10] sm:$0xff]  ;;  %v229_v12 = vmov 0   ;;  %vm34_vm0 = vcmask 7168   ;;  %vm48_vm1 = vcmask 15368   ;;  %v55_v13 = vlaneseq }
  0x10   :  { %v262_v2 = vld [vmem:[%s333_s1 + $0x20] sm:$0xff]  ;;  %v28_v3 = vadd.f32 %v257_v1, %v252_v0  ;;  %v269_v4 = vld [vmem:[%s333_s1 + $0x28] sm:$0xff]  ;;  %v279_v6 = vld [vmem:[%s333_s1 + $0x18] sm:$0xff]  ;;  %203 = vset.pattern.permute.xlu1 %v229_v12  ;;  %202 = vset.pattern.permute.xlu0 %v229_v12  ;;  %s187_s29 = sld [smem:[#allocation3 + $0x1]]  ;;  %vm126_vm6 = vcmask 15360   ;;  %v230_v59 = vmov 1  }
  0x11   :  { %v42_v7 = vadd.f32 %v269_v4, %v262_v2  ;;  %v286_v8 = vld [vmem:[%s333_s1 + $0x30] sm:$0xff]  ;;  %v291_v9 = vld [vmem:[%s333_s1 + $0x38] sm:$0xff]  ;;  %v31_v10 = vadd.f32 %v279_v6, %v274_v5  ;;  %v56_v16 = vshrl.u32 %v55_v13, 7  ;;  %s71_s1 = sld [smem:[#allocation3]] }
  0x12   :  { %29 = vadd.xlane.f32.xlu0 %v28_v3  ;;  %v45_v11 = vadd.f32 %v291_v9, %v286_v8  ;;  %s297_s30 = sld [smem:[#allocation3 + $0x2]] }
  0x13   :  { %43 = vadd.xlane.f32.xlu1 %v42_v7  ;;  %v57_v19 = vadd.s32 8, %v56_v16  ;;  %v63_v21 = vadd.s32 4294967295, %v56_v16  ;;  %vm60_vm2 = vcmp.lt.s32.totalorder %v56_v16, 1  ;;  %vm95_vm4 = vcmp.lt.s32.totalorder %v56_v16, 7 }
  0x15   :  { %v99_v22 = vadd.s32 1, %v57_v19  ;;  %vm65_vm3 = vcmp.ge.s32.totalorder %v63_v21, 0 }
  0x16   :  { %32 = vadd.xlane.f32.xlu0 %v31_v10  ;;  %v88_v31 = vstv %s187_s29 }
  0x17   :  { %46 = vadd.xlane.f32.xlu1 %v45_v11  ;;  %v74_v26 = vstv %s71_s1  ;;  %vm103_vm5 = vcmp.lt.s32.totalorder %v99_v22, 16 }
  0x18   :  { %v109_v32 = vstv %s297_s30 }
  0x9b   :  { %v30_v14 = vpop.xlane.xlu0 %29 }
  0x9c   :  { %35 = vst.msk [vmem:[#allocation2] sm:$0xff] %vm34_vm0, %v30_v14  ;;  %v44_v15 = vpop.xlane.xlu1 %43 }
  0x9d   :  { %49 = vst.msk [vmem:[#allocation2] sm:$0xff] %vm48_vm1, %v44_v15 }
  0x9f   :  { %v33_v17 = vpop.xlane.xlu0 %32 }
  0xa0   :  { %36 = vst.msk [vmem:[#allocation2 + $0x8] sm:$0xff] %vm34_vm0, %v33_v17  ;;  %v47_v18 = vpop.xlane.xlu1 %46 }
  0xa1   :  { %50 = vst.msk [vmem:[#allocation2 + $0x8] sm:$0xff] %vm48_vm1, %v47_v18 }
  0xa4   :  { %v51_v20 = vld [vmem:[#allocation2] sm:$0xff] }
  0xa5   :  { %v53_v23 = vmul.f32 0.00390625, %v51_v20 }
  0xa7   :  { %v58_v27 = vrot.slane %v53_v23, 7  ;;  %v93_v29 = vrot.slane %v53_v23, 1  ;;  %v89_v42 = vmul.f32 %v88_v31, %v53_v23 }
  0xa8   :  { %v52_v24 = vld [vmem:[#allocation2 + $0x8] sm:$0xff] }
  0xa9   :  { %v54_v25 = vmul.f32 0.00390625, %v52_v24 }
  0xab   :  { %v59_v28 = vrot.slane %v54_v25, 7  ;;  %v94_v30 = vrot.slane %v54_v25, 1  ;;  %v90_v35 = vmul.f32 %v88_v31, %v54_v25 }
  0xad   :  { %v61_v33 = vsel %vm60_vm2, %v58_v27, %v59_v28  ;;  %v62_v34 = vsel %vm60_vm2, %v59_v28, %v58_v27  ;;  %v97_v36 = vsel %vm95_vm4, %v94_v30, %v93_v29  ;;  %v96_v39 = vsel %vm95_vm4, %v93_v29, %v94_v30 }
  0xae   :  { %v72_v37 = vsel %vm65_vm3, %v62_v34, 0.0  ;;  %v76_v38 = vmul.f32 %v74_v26, %v61_v33  ;;  %v108_v40 = vsel %vm103_vm5, %v97_v36, 0.0  ;;  %v110_v46 = vmul.f32 %v109_v32, %v96_v39 }
  0xaf   :  { %v75_v41 = vmul.f32 %v74_v26, %v72_v37  ;;  %v111_v43 = vmul.f32 %v109_v32, %v108_v40 }
  0xb0   :  { %v92_v44 = vadd.f32 %v90_v35, %v76_v38 }
  0xb1   :  { %v91_v45 = vadd.f32 %v89_v42, %v75_v41 }
  0xb2   :  { %v113_v47 = vadd.f32 %v111_v43, %v92_v44 }
  0xb3   :  { %v112_v48 = vadd.f32 %v110_v46, %v91_v45 }
  0xb4   :  { %v190_v49 = vmul.f32 -1.442695, %v113_v47 }
  0xb5   :  { %v189_v50 = vmul.f32 -1.442695, %v112_v48 }
  0xb6   :  { %206 = vpow2.f32 %v190_v49 }
  0xb7   :  { %208 = vpow2.f32 %v189_v50 }
  0xc3   :  { %v207_v51 = vpop.eup %206 }
  0xc4   :  { %v209_v52 = vpop.eup %208  ;;  %v121_v53 = vadd.f32 1.0, %v207_v51 }
  0xc5   :  { %v120_v54 = vadd.f32 1.0, %v209_v52 }
  0xc6   :  { %210 = vrcp.f32 %v121_v53 }
  0xc7   :  { %212 = vrcp.f32 %v120_v54 }
  0xd3   :  { %v211_v55 = vpop.eup %210 }
  0xd4   :  { %v213_v56 = vpop.eup %212  ;;  %128 = vst.msk [vmem:[#allocation2 + $0x8] sm:$0xff] %vm126_vm6, %v211_v55 }
  0xd5   :  { %127 = vst.msk [vmem:[#allocation2] sm:$0xff] %vm126_vm6, %v213_v56 }
  0xdb   :  { %v130_v57 = vld [vmem:[#allocation2 + $0x8] sm:$0xff] }
  0xdc   :  { %142 = vperm.xlu1 %203, %v130_v57   ;;  %v129_v58 = vld [vmem:[#allocation2] sm:$0xff] }
  0xdd   :  { %137 = vperm.xlu0 %202, %v129_v58  }
  0xe0   :  { %204 = vset.pattern.permute.xlu1 %v230_v59 }
  0xe1   :  { %161 = vperm.xlu1 %204, %v129_v58   ;;  %205 = vset.pattern.permute.xlu0 %v230_v59 }
  0xe5   :  { %166 = vperm.xlu1 %204, %v130_v57  }
 0x157   :  { %v143_v60 = vpop.permute.xlu1 %142 }
 0x158   :  { %v147_v61 = vmul.f32 %v143_v60, %v274_v5  ;;  %v148_v62 = vmul.f32 %v143_v60, %v279_v6  ;;  %v138_v63 = vpop.permute.xlu0 %137 }
 0x159   :  { %v145_v3 = vmul.f32 %v138_v63, %v252_v0  ;;  %v146_v7 = vmul.f32 %v138_v63, %v257_v1 }
 0x15a   :  { %151 = vst [vmem:[%s334_s2 + $0x10] sm:$0xff] %v147_v61  ;;  %152 = vst [vmem:[%s334_s2 + $0x18] sm:$0xff] %v148_v62 }
 0x15b   :  { %149 = vst [vmem:[%s334_s2] sm:$0xff] %v145_v3  ;;  %150 = vst [vmem:[%s334_s2 + $0x8] sm:$0xff] %v146_v7 }
 0x15c   :  { %v162_v5 = vpop.permute.xlu1 %161 }
 0x15d   :  { %v169_v0 = vmul.f32 %v262_v2, %v162_v5  ;;  %v170_v1 = vmul.f32 %v269_v4, %v162_v5 }
 0x15f   :  { %195 = vst [vmem:[%s334_s2 + $0x20] sm:$0xff] %v169_v0  ;;  %196 = vst [vmem:[%s334_s2 + $0x28] sm:$0xff] %v170_v1 }
 0x160   :  { %v167_v6 = vpop.permute.xlu1 %166 }
 0x161   :  { %v171_v10 = vmul.f32 %v286_v8, %v167_v6  ;;  %v172_v11 = vmul.f32 %v291_v9, %v167_v6 }
 0x163   :  { %197 = vst [vmem:[%s334_s2 + $0x30] sm:$0xff] %v171_v10  ;;  %198 = vst [vmem:[%s334_s2 + $0x38] sm:$0xff] %v172_v11 }
 0x164   :  { %182 = vsyncpa [#allocation4], 1 }

</bundles_post_ra>
